<compile_context>
chip_gen: v5e
topology: v5e:2x2
jax: 0.10.0
libtpu: 0.0.40
codegen_flags: <defaults>
</compile_context>

<pallas_src>
import functools

import jax
import jax.numpy as jnp
from jax.experimental import pallas as pl
from jax.experimental.pallas import tpu as pltpu


def _round_up(x: int, m: int) -> int:
    return ((x + m - 1) // m) * m


def _joiner_kernel(src_ref, tgt_ref, w_ref, b_ref, out_ref, act_ref):
    # src_ref: (1, tT, D) f32      tgt_ref: (1, tU, D) f32
    # w_ref:   (D, Vp)    bf16  (VMEM-resident, constant index_map)
    # b_ref:   (1, Vp)    f32   (VMEM-resident, constant index_map)
    # out_ref: (1, tT, tU, tV)
    # act_ref: (tT*tU, D) bf16 scratch, persistent across grid steps.
    tile_t = src_ref.shape[1]
    tile_u = tgt_ref.shape[1]
    tile_v = out_ref.shape[3]

    # V is the innermost grid axis: a fresh (b, t-tile, u-tile) starts exactly
    # when program_id(3) == 0, so the ReLU'd joint is built once per (T, U)
    # tile and reused for every V tile (pure MXU work in the inner loop).
    # NOTE: this guard is only correct while V stays the innermost grid axis.
    @pl.when(pl.program_id(3) == 0)
    def _():
        src = src_ref[0]                               # (tT, D) f32
        tgt = tgt_ref[0]                               # (tU, D) f32
        joint = src[:, None, :] + tgt[None, :, :]      # (tT, tU, D) f32 (VPU)
        act = jnp.maximum(joint, 0.0)                  # ReLU
        # f32 -> bf16 cast fused into the scratch store.
        act_ref[...] = act.reshape(tile_t * tile_u, -1).astype(act_ref.dtype)

    # Slice the vi-th lane-aligned column block out of the resident weight/bias.
    v_start = pl.multiple_of(pl.program_id(3) * tile_v, 128)
    w_col = w_ref[:, pl.ds(v_start, tile_v)]           # (D, tV) bf16
    b_col = b_ref[:, pl.ds(v_start, tile_v)]           # (1, tV) f32

    # MXU: (tT*tU, D) bf16 @ (D, tV) bf16 -> f32 accumulate.
    out = jnp.dot(act_ref[...], w_col,
                  preferred_element_type=jnp.float32)  # (tT*tU, tV)
    out = out + b_col                                  # bias add in f32
    out_ref[0] = out.reshape(tile_t, tile_u, tile_v).astype(out_ref.dtype)


@functools.partial(jax.jit,
                   static_argnames=("tile_t", "tile_u", "tile_v", "out_dtype"))
def rnnt_join(source_encodings, source_lengths, target_encodings, target_lengths,
              weight, bias, *, tile_t=16, tile_u=16, tile_v=512,
              out_dtype=jnp.float32):
    """Pallas implementation of RNNT.join.

    source_encodings: (B, T, D) f32
    target_encodings: (B, U, D) f32
    weight:           (D, V)    (already transposed from torch's (V, D))
    bias:             (V,)
    Returns (output (B, T, U, V) out_dtype, source_lengths, target_lengths).

    Matmul operands are cast to bf16 (f32 accumulation), so results differ from
    a pure-f32 torch Linear by ~bf16 rounding.  For production joiner shapes
    (D=1024, V=4097) use tile_t=tile_u=16..32, tile_v=512..1024; pass
    out_dtype=jnp.bfloat16 if the downstream log-softmax tolerates it (halves
    the dominant HBM write stream on v6e/v7x).
    """
    B, T, D = source_encodings.shape
    _, U, _ = target_encodings.shape
    V = weight.shape[1]

    # Tile sanitation: sublane-align T/U tiles, lane-align V tile, cap at the
    # (padded) array extents so small problems do not over-pad.
    tile_t = max(8, _round_up(tile_t, 8))
    tile_u = max(8, _round_up(tile_u, 8))
    tile_v = max(128, _round_up(tile_v, 128))
    tile_t = min(tile_t, _round_up(T, 8))
    tile_u = min(tile_u, _round_up(U, 8))
    tile_v = min(tile_v, _round_up(V, 128))

    # Pad T / U / V up to tile multiples.  No fallback to a narrower V tile:
    # a few extra padded lanes are far cheaper than 128-wide MXU slivers.
    Tp = _round_up(T, tile_t)
    Up = _round_up(U, tile_u)
    Vp = _round_up(V, tile_v)

    src = source_encodings
    tgt = target_encodings
    if Tp != T:
        src = jnp.pad(src, ((0, 0), (0, Tp - T), (0, 0)))
    if Up != U:
        tgt = jnp.pad(tgt, ((0, 0), (0, Up - U), (0, 0)))

    w = weight.astype(jnp.bfloat16)       # halve weight DMA + VMEM footprint
    b2 = bias.astype(jnp.float32)
    if Vp != V:
        w = jnp.pad(w, ((0, 0), (0, Vp - V)))
        b2 = jnp.pad(b2, (0, Vp - V))
    b2 = b2.reshape(1, Vp)

    grid = (B, Tp // tile_t, Up // tile_u, Vp // tile_v)
    out_itemsize = jnp.dtype(out_dtype).itemsize

    # Real HBM traffic: src once, tgt once per T tile, weight/bias once
    # (VMEM-resident), output once.
    cost = pl.CostEstimate(
        flops=2 * B * Tp * Up * D * Vp,
        transcendentals=0,
        bytes_accessed=(src.size * 4
                        + tgt.size * 4 * (Tp // tile_t)
                        + w.size * 2 + b2.size * 4
                        + B * Tp * Up * Vp * out_itemsize),
    )

    # VMEM footprint (resident weight + double-buffered blocks + scratch); raise
    # the scoped limit accordingly (v5e default is 16 MiB), cap well under the
    # 64 MiB physical per-TC VMEM on v7x.
    vmem_need = (2 * D * Vp * 2                 # bf16 weight (2 buffers)
                 + 2 * Vp * 4                   # bias
                 + 2 * tile_t * D * 4           # src block
                 + 2 * tile_u * D * 4           # tgt block
                 + 2 * tile_t * tile_u * tile_v * out_itemsize   # out block
                 + tile_t * tile_u * D * 2)     # act scratch
    vmem_limit = int(min(max(vmem_need * 5 // 4 + (1 << 20), 32 << 20), 56 << 20))

    out = pl.pallas_call(
        _joiner_kernel,
        out_shape=jax.ShapeDtypeStruct((B, Tp, Up, Vp), out_dtype),
        grid_spec=pltpu.PrefetchScalarGridSpec(
            num_scalar_prefetch=0,
            grid=grid,
            in_specs=[
                pl.BlockSpec((1, tile_t, D), lambda b, ti, ui, vi: (b, ti, 0)),
                pl.BlockSpec((1, tile_u, D), lambda b, ti, ui, vi: (b, ui, 0)),
                # Weight / bias: full arrays, constant block index => DMA'd from
                # HBM exactly once and kept resident in VMEM for the whole call.
                pl.BlockSpec((D, Vp), lambda b, ti, ui, vi: (0, 0)),
                pl.BlockSpec((1, Vp), lambda b, ti, ui, vi: (0, 0)),
            ],
            out_specs=pl.BlockSpec(
                (1, tile_t, tile_u, tile_v),
                lambda b, ti, ui, vi: (b, ti, ui, vi)),
            scratch_shapes=[pltpu.VMEM((tile_t * tile_u, D), jnp.bfloat16)],
        ),
        compiler_params=pltpu.CompilerParams(
            dimension_semantics=("parallel", "parallel", "parallel", "arbitrary"),
            vmem_limit_bytes=vmem_limit),
        cost_estimate=cost,
    )(src, tgt, w, b2)

    # Slice off the T/U/V padding.
    if (Tp, Up, Vp) != (T, U, V):
        out = out[:, :T, :U, :V]

    # Lengths are pass-through in the joiner (matches torchaudio).
    # TODO(synk): like the torchaudio joiner, no masking by source/target
    # lengths is applied; positions past the valid lengths are defined but
    # meaningless, same as the reference.
    return out, source_lengths, target_lengths


if __name__ == "__main__":
    # Small shapes consistent with the joiner's forward (real model:
    # D=1024, V=4097). V=200 deliberately not lane-aligned to exercise the
    # pad/slice path.
    B, T, U, D, V = 2, 16, 16, 128, 200

    key = jax.random.PRNGKey(0)
    k_src, k_tgt, k_w, k_b = jax.random.split(key, 4)

    source_encodings = jax.random.normal(k_src, (B, T, D), dtype=jnp.float32)
    target_encodings = jax.random.normal(k_tgt, (B, U, D), dtype=jnp.float32)
    source_lengths = jnp.full((B,), T, dtype=jnp.int32)
    target_lengths = jnp.full((B,), U, dtype=jnp.int32)

    # torch.nn.Linear(D, V): weight (V, D), bias (V,) — transpose for kernel.
    w_torch_layout = jax.random.normal(k_w, (V, D), dtype=jnp.float32) * 0.05
    bias = jax.random.normal(k_b, (V,), dtype=jnp.float32) * 0.05
    weight = w_torch_layout.T  # (D, V)

    out, src_len, tgt_len = rnnt_join(
        source_encodings, source_lengths, target_encodings, target_lengths,
        weight, bias, tile_t=16, tile_u=16, tile_v=512)
    jax.block_until_ready(out)

    # Pure-JAX reference mirroring the kernel's bf16-operand / f32-accumulate
    # matmul (so the comparison is tight).
    joint = source_encodings[:, :, None, :] + target_encodings[:, None, :, :]
    act = jnp.maximum(joint, 0.0).astype(jnp.bfloat16)
    ref = jnp.dot(act.reshape(-1, D), weight.astype(jnp.bfloat16),
                  preferred_element_type=jnp.float32).reshape(B, T, U, V) + bias

    assert out.shape == (B, T, U, V)
    assert jnp.allclose(out, ref, atol=1e-2, rtol=1e-2), (
        float(jnp.max(jnp.abs(out - ref))))
    assert jnp.array_equal(src_len, source_lengths)
    assert jnp.array_equal(tgt_len, target_lengths)

    print("KERNEL_OK")
</pallas_src>

<mosaic_0001>
module attributes {stable_mosaic.version = 11 : i64} {
  func.func @_joiner_kernel(%arg0: i32, %arg1: i32, %arg2: i32, %arg3: i32, %arg4: memref<1x16x128xf32, #tpu.memory_space<vmem>>, %arg5: memref<1x16x128xf32, #tpu.memory_space<vmem>>, %arg6: memref<128x256xbf16, #tpu.memory_space<vmem>>, %arg7: memref<1x256xf32, #tpu.memory_space<vmem>>, %arg8: memref<1x16x16x256xf32, #tpu.memory_space<vmem>>, %arg9: memref<256x128xbf16, #tpu.memory_space<vmem>>) attributes {dimension_semantics = [#tpu.dimension_semantics<parallel>, #tpu.dimension_semantics<parallel>, #tpu.dimension_semantics<parallel>, #tpu.dimension_semantics<arbitrary>], iteration_bounds = array<i64: 2, 1, 1, 1>, scalar_prefetch = 0 : i64, scratch_operands = 1 : i64, tpu.core_type = #tpu.core_type<tc>, window_params = [{transform_indices = @transform_0, window_bounds = array<i64: 1, 16, 128>}, {transform_indices = @transform_1, window_bounds = array<i64: 1, 16, 128>}, {pipeline_mode = #tpu.pipeline_mode<synchronous>, transform_indices = @transform_2, window_bounds = array<i64: 128, 256>}, {pipeline_mode = #tpu.pipeline_mode<synchronous>, transform_indices = @transform_3, window_bounds = array<i64: 1, 256>}, {transform_indices = @transform_4, window_bounds = array<i64: 1, 16, 16, 256>}]} {
    %c0_i32 = arith.constant 0 : i32
    %0 = arith.cmpi eq, %arg3, %c0_i32 : i32
    %1 = arith.extui %0 : i1 to i32
    %c0_i32_0 = arith.constant 0 : i32
    %2 = arith.cmpi ne, %1, %c0_i32_0 : i32
    scf.if %2 {
      %c0_8 = arith.constant 0 : index
      %c0_9 = arith.constant 0 : index
      %c0_10 = arith.constant 0 : index
      %17 = vector.load %arg4[%c0_8, %c0_9, %c0_10] : memref<1x16x128xf32, #tpu.memory_space<vmem>>, vector<1x16x128xf32>
      %18 = vector.shape_cast %17 : vector<1x16x128xf32> to vector<16x128xf32>
      %c0_11 = arith.constant 0 : index
      %c0_12 = arith.constant 0 : index
      %c0_13 = arith.constant 0 : index
      %19 = vector.load %arg5[%c0_11, %c0_12, %c0_13] : memref<1x16x128xf32, #tpu.memory_space<vmem>>, vector<1x16x128xf32>
      %20 = vector.shape_cast %19 : vector<1x16x128xf32> to vector<16x128xf32>
      %21 = vector.shape_cast %18 : vector<16x128xf32> to vector<16x1x128xf32>
      %22 = vector.shape_cast %20 : vector<16x128xf32> to vector<1x16x128xf32>
      %23 = vector.broadcast %21 : vector<16x1x128xf32> to vector<16x16x128xf32>
      %24 = vector.broadcast %22 : vector<1x16x128xf32> to vector<16x16x128xf32>
      %25 = arith.addf %23, %24 : vector<16x16x128xf32>
      %cst_14 = arith.constant 0.000000e+00 : f32
      %26 = vector.broadcast %cst_14 : f32 to vector<16x16x128xf32>
      %27 = arith.maximumf %25, %26 : vector<16x16x128xf32>
      %28 = vector.shape_cast %27 : vector<16x16x128xf32> to vector<256x128xf32>
      %29 = arith.truncf %28 : vector<256x128xf32> to vector<256x128xbf16>
      %c0_15 = arith.constant 0 : index
      %c0_16 = arith.constant 0 : index
      %30 = vector.load %arg9[%c0_15, %c0_16] : memref<256x128xbf16, #tpu.memory_space<vmem>>, vector<256x128xbf16>
      tpu.vector_store %arg9[%c0_15, %c0_16], %29 {strides = array<i32>} : memref<256x128xbf16, #tpu.memory_space<vmem>>, vector<256x128xbf16>,
    } else {
    }
    %c256_i32 = arith.constant 256 : i32
    %3 = arith.muli %arg3, %c256_i32 : i32
    %4 = tpu.assume_multiple %3, 128 : i32
    %c0 = arith.constant 0 : index
    %5 = arith.index_cast %4 : i32 to index
    %6 = vector.load %arg6[%c0, %5] : memref<128x256xbf16, #tpu.memory_space<vmem>>, vector<128x256xbf16>
    %c0_1 = arith.constant 0 : index
    %7 = arith.index_cast %4 : i32 to index
    %8 = vector.load %arg7[%c0_1, %7] : memref<1x256xf32, #tpu.memory_space<vmem>>, vector<1x256xf32>
    %c0_2 = arith.constant 0 : index
    %c0_3 = arith.constant 0 : index
    %9 = vector.load %arg9[%c0_2, %c0_3] : memref<256x128xbf16, #tpu.memory_space<vmem>>, vector<256x128xbf16>
    %cst = arith.constant dense<0.000000e+00> : vector<256x256xf32>
    %10 = tpu.matmul %9, %6, %cst {dimension_numbers = #tpu.dot_dimension_numbers<[1], [0], [0], [1], [0, 0, 1, 1], [], []>} : vector<256x128xbf16>, vector<128x256xbf16>, vector<256x256xf32> -> vector<256x256xf32>
    %11 = vector.broadcast %8 : vector<1x256xf32> to vector<256x256xf32>
    %12 = arith.addf %10, %11 : vector<256x256xf32>
    %13 = vector.shape_cast %12 : vector<256x256xf32> to vector<16x16x256xf32>
    %c0_4 = arith.constant 0 : index
    %c0_5 = arith.constant 0 : index
    %c0_6 = arith.constant 0 : index
    %c0_7 = arith.constant 0 : index
    %14 = vector.load %arg8[%c0_4, %c0_5, %c0_6, %c0_7] : memref<1x16x16x256xf32, #tpu.memory_space<vmem>>, vector<1x16x16x256xf32>
    %15 = vector.shape_cast %14 : vector<1x16x16x256xf32> to vector<16x16x256xf32>
    %16 = vector.shape_cast %13 : vector<16x16x256xf32> to vector<1x16x16x256xf32>
    tpu.vector_store %arg8[%c0_4, %c0_5, %c0_6, %c0_7], %16 {strides = array<i32>} : memref<1x16x16x256xf32, #tpu.memory_space<vmem>>, vector<1x16x16x256xf32>,
    return
  }
  func.func @transform_0(%arg0: i32, %arg1: i32, %arg2: i32, %arg3: i32) -> (i32, i32, i32) {
    %c0_i32 = arith.constant 0 : i32
    %c0_i32_0 = arith.constant 0 : i32
    return %arg0, %arg1, %c0_i32 : i32, i32, i32
  }
  func.func @transform_1(%arg0: i32, %arg1: i32, %arg2: i32, %arg3: i32) -> (i32, i32, i32) {
    %c0_i32 = arith.constant 0 : i32
    %c0_i32_0 = arith.constant 0 : i32
    return %arg0, %arg2, %c0_i32 : i32, i32, i32
  }
  func.func @transform_2(%arg0: i32, %arg1: i32, %arg2: i32, %arg3: i32) -> (i32, i32) {
    %c0_i32 = arith.constant 0 : i32
    %c0_i32_0 = arith.constant 0 : i32
    %c0_i32_1 = arith.constant 0 : i32
    return %c0_i32, %c0_i32_0 : i32, i32
  }
  func.func @transform_3(%arg0: i32, %arg1: i32, %arg2: i32, %arg3: i32) -> (i32, i32) {
    %c0_i32 = arith.constant 0 : i32
    %c0_i32_0 = arith.constant 0 : i32
    %c0_i32_1 = arith.constant 0 : i32
    return %c0_i32, %c0_i32_0 : i32, i32
  }
  func.func @transform_4(%arg0: i32, %arg1: i32, %arg2: i32, %arg3: i32) -> (i32, i32, i32, i32) {
    %c0_i32 = arith.constant 0 : i32
    return %arg0, %arg1, %arg2, %arg3 : i32, i32, i32, i32
  }
}

</mosaic_0001>

<bundles_post_ra>
// kernel: rnnt_join.1
= control target key start
LH: loop header
LB: loop body
LE: loop exit
PB: predicated region body
PF: predicated region fallthrough
CT: control target
= control target key end

     0   :  { %9 = vsyncpa [#allocation4], 0  ;;  %s1926_s0 = inlined_call_operand.vmem [shape: f32[2,16,128], index: 0, kind: input, shape index: {}]   ;;  %s1927_s1 = inlined_call_operand.vmem [shape: f32[2,16,128], index: 1, kind: input, shape index: {}]   ;;  %s1928_s2 = inlined_call_operand.vmem [shape: bf16[128,256], index: 2, kind: input, shape index: {}]   ;;  %s1929_s3 = inlined_call_operand.vmem [shape: f32[1,256], index: 3, kind: input, shape index: {}]   ;;  %s1930_s4 = inlined_call_operand.hbm [shape: f32[2,16,16,256], index: 4, kind: output, shape index: {}]  }
   0x1   :  { %11 = vsyncpa [#allocation4 + $0x1], 0  ;;  %s1532_s15 = smov 0   ;;  %s1534_s16 = smov 0  }
   0x2   :  { %s1536_s17 = smov 0   ;;  %s1538_s18 = smov 0  }
   0x3   :  { %s1540_s19 = smov 0   ;;  %s1542_s20 = smov 0  }
   0x4 LB: > { %s1079_s21 = sadd.s32 4294967295, %s1503_s20   ;;  %s1080_s22 = sadd.s32 4294967294, %s1503_s20   ;;  %s1503_s20 = sphi %s1542_s20, %s17_s20   ;;  %s1499_s19 = sphi %s1540_s19, %s1937_s19   ;;  %s1495_s18 = sphi %s1538_s18, %s1936_s18   ;;  %s1491_s17 = sphi %s1536_s17, %s1935_s17   ;;  %s1487_s16 = sphi %s1534_s16, %s1934_s16   ;;  %s1483_s15 = sphi %s1532_s15, %s1933_s15  }
   0x5   : > { %s43_s23 = sadd.s32 1, %s1499_s19  ;;  %s154_s24 = sadd.s32 1, %s1491_s17 }
   0x6   : > { %p45_p0 = scmp.ge.s32.totalorder %s43_s23, 2  ;;  %p164_p1 = scmp.ne.s32.totalorder %s1491_s17, %s1487_s16 }
   0x7   : > { %p165_p2 = scmp.eq.s32.totalorder %s1079_s21, 1  ;;  %p170_p3 = scmp.ne.s32.totalorder %s1487_s16, %s1483_s15 }
   0x8   : > { %s1939_s23 = smov (%p45_p0, %s43_s23), 0  ;;  %p171_p5 = scmp.eq.s32.totalorder %s1080_s22, 1 }
   0x9   : > { %p1572_p4 = por %p165_p2, %p164_p1  ;;  %s145_s26 = ssub.s32 %s1499_s19, %s1939_s23 }
   0xa   : > { %p1083_p6 = scmp.ge.s32.totalorder %s1503_s20, 1  ;;  %p152_p7 = scmp.eq.s32.totalorder %s145_s26, 0 }
   0xb   : > { %p1579_p8 = por %p171_p5, %p170_p3  ;;  %p221_p9 = scmp.lt.s32.totalorder %s1503_s20, 3 }
   0xc   : > { %s1585_s28 = scalar_select %p152_p7, %s1491_s17, %s154_s24  }
   0xd   : > { %p222_p10 = pnand %p1083_p6, %p221_p9 }
   0xe   : > { %p261_p11 = scmp.lt.s32.totalorder (!%p222_p10), %s1495_s18, 1  ;;  %s257_s11 = sand.u32 (!%p222_p10), 1, %s1487_s16  }
   0xf   : > { %225 = sbr.rel (%p222_p10) target bundleno = 313 (0x139), region = 36  ;;  %s1084_s21 = sshll.u32 (!%p222_p10), %s257_s11, 9 }
  0x10   : > { %s1256_s24 = sshll.u32 (!%p222_p10), %s1495_s18, 9  ;;  %s946_s5 = scalar_lea.sflag (!%p222_p10), [#allocation4], %s257_s11 }
  0x11   : > { %s1445_s10 = scalar_lea.hbm (!%p222_p10), %s1930_s4, 1024 }
  0x14   : > { %v1211_v0 = vld [vmem:[%s1928_s2 + $0x70] sm:$0xf]  ;;  %v1239_v1 = vld [vmem:[%s1928_s2 + $0x74] sm:$0xf0]  ;;  %v1238_v2 = vld [vmem:[%s1928_s2 + $0x74] sm:$0xf] }
  0x15   : > { %v1212_v3 = vor.u32 %v1239_v1, %v1211_v0  ;;  %v1213_v4 = vld [vmem:[%s1928_s2 + $0x78] sm:$0xf0]  ;;  %v1203_v5 = vld [vmem:[%s1928_s2 + $0x60] sm:$0xf]  ;;  %v1237_v6 = vld [vmem:[%s1928_s2 + $0x64] sm:$0xf0] }
  0x16   : > { %v1216_v7 = vor.u32 %v1238_v2, %v1213_v4  ;;  %v1236_v8 = vld [vmem:[%s1928_s2 + $0x64] sm:$0xf]  ;;  %v1205_v9 = vld [vmem:[%s1928_s2 + $0x68] sm:$0xf0]  ;;  %v1204_v10 = vor.u32 %v1237_v6, %v1203_v5  ;;  %v1195_v12 = vld [vmem:[%s1928_s2 + $0x50] sm:$0xf] }
  0x17   : > { %703 = vmatpush.bf16.msra.mxu0 %v1212_v3  ;;  %1352 = vmatpush.bf16.msra.mxu2 %v1212_v3  ;;  %v1208_v11 = vor.u32 %v1236_v8, %v1205_v9  ;;  %v1235_v13 = vld [vmem:[%s1928_s2 + $0x54] sm:$0xf0]  ;;  %v1234_v14 = vld [vmem:[%s1928_s2 + $0x54] sm:$0xf]  ;;  %v1197_v15 = vld [vmem:[%s1928_s2 + $0x58] sm:$0xf0] }
  0x18   : > { %792 = vmatpush.bf16.msra.mxu1 %v1216_v7  ;;  %1360 = vmatpush.bf16.msra.mxu3 %v1216_v7  ;;  %v1196_v16 = vor.u32 %v1235_v13, %v1195_v12  ;;  %v1200_v17 = vor.u32 %v1234_v14, %v1197_v15  ;;  %v1187_v18 = vld [vmem:[%s1928_s2 + $0x40] sm:$0xf]  ;;  %v1233_v19 = vld [vmem:[%s1928_s2 + $0x44] sm:$0xf0]  ;;  %v1232_v20 = vld [vmem:[%s1928_s2 + $0x44] sm:$0xf] }
  0x19   : > { %v1189_v21 = vld [vmem:[%s1928_s2 + $0x48] sm:$0xf0]  ;;  %v1188_v22 = vor.u32 %v1233_v19, %v1187_v18  ;;  %v1179_v23 = vld [vmem:[%s1928_s2 + $0x30] sm:$0xf]  ;;  %v1231_v24 = vld [vmem:[%s1928_s2 + $0x34] sm:$0xf0] }
  0x1a   : > { %v1230_v25 = vld [vmem:[%s1928_s2 + $0x34] sm:$0xf]  ;;  %v1192_v26 = vor.u32 %v1232_v20, %v1189_v21  ;;  %v1181_v27 = vld [vmem:[%s1928_s2 + $0x38] sm:$0xf0]  ;;  %v1171_v28 = vld [vmem:[%s1928_s2 + $0x20] sm:$0xf]  ;;  %v1180_v34 = vor.u32 %v1231_v24, %v1179_v23 }
  0x1b   : > { %704 = vmatpush.bf16.msra.mxu0 %v1204_v10  ;;  %1353 = vmatpush.bf16.msra.mxu2 %v1204_v10  ;;  %s262_s13 = scalar_select %p261_p11, %s1495_s18, 1  ;;  %v1229_v29 = vld [vmem:[%s1928_s2 + $0x24] sm:$0xf0]  ;;  %v1228_v30 = vld [vmem:[%s1928_s2 + $0x24] sm:$0xf]  ;;  %v1184_v37 = vor.u32 %v1230_v25, %v1181_v27 }
  0x1c   : > { %793 = vmatpush.bf16.msra.mxu1 %v1208_v11  ;;  %1361 = vmatpush.bf16.msra.mxu3 %v1208_v11  ;;  %v1173_v31 = vld [vmem:[%s1928_s2 + $0x28] sm:$0xf0]  ;;  %v1163_v32 = vld [vmem:[%s1928_s2 + $0x10] sm:$0xf]  ;;  %v1227_v33 = vld [vmem:[%s1928_s2 + $0x14] sm:$0xf0]  ;;  %v1172_v38 = vor.u32 %v1229_v29, %v1171_v28 }
  0x1d   : > { %s1222_s8 = sshll.u32 %s262_s13, 4  ;;  %v1226_v35 = vld [vmem:[%s1928_s2 + $0x14] sm:$0xf]  ;;  %v1165_v36 = vld [vmem:[%s1928_s2 + $0x18] sm:$0xf0]  ;;  %v1176_v39 = vor.u32 %v1228_v30, %v1173_v31  ;;  %v1164_v43 = vor.u32 %v1227_v33, %v1163_v32  ;;  %s965_s13 = scalar_lea.hbm %s1930_s4, %s1256_s24 }
  0x1e   : > { %s268_s22 = scalar_lea.vmem %s1926_s0, %s1222_s8  ;;  %s278_s29 = scalar_lea.vmem %s1927_s1, %s1222_s8  ;;  %v1168_v48 = vor.u32 %v1226_v35, %v1165_v36  ;;  %v1155_v8 = vld [vmem:[%s1928_s2] sm:$0xf]  ;;  %v1225_v9 = vld [vmem:[%s1928_s2 + $0x4] sm:$0xf0]  ;;  %v1224_v14 = vld [vmem:[%s1928_s2 + $0x4] sm:$0xf] }
  0x1f   : > { %705 = vmatpush.bf16.msra.mxu0 %v1196_v16  ;;  %1354 = vmatpush.bf16.msra.mxu2 %v1196_v16  ;;  %v1679_v40 = vld [vmem:[%s268_s22] sm:$0xff]  ;;  %v1683_v42 = vld [vmem:[%s278_s29 + $0x8] sm:$0xff]  ;;  %s968_s30 = sshll.u32 %s965_s13, 4  ;;  %s969_s30 = int_to_ptr.hbm [resolvable:$true] %s968_s30 }
  0x20   : > { %794 = vmatpush.bf16.msra.mxu1 %v1200_v17  ;;  %1362 = vmatpush.bf16.msra.mxu3 %v1200_v17  ;;  %v1681_v41 = vld [vmem:[%s278_s29] sm:$0xff]  ;;  %v307_v44 = vperm.slane %v1679_v40, 0  ;;  %v1686_v45 = vld [vmem:[%s268_s22 + $0x8] sm:$0xff]  ;;  %v293_v46 = vrot.slane %v1679_v40, 1  ;;  %v294_v47 = vrot.slane %v1679_v40, 2  ;;  %v295_v30 = vrot.slane %v1679_v40, 3 }
  0x21   : > { %v315_v49 = vperm.slane %v1686_v45, 0  ;;  %v300_v50 = vrot.slane %v1686_v45, 1  ;;  %v301_v51 = vrot.slane %v1686_v45, 2  ;;  %v1157_v15 = vld [vmem:[%s1928_s2 + $0x8] sm:$0xf0]  ;;  %v302_v31 = vrot.slane %v1686_v45, 3 }
  0x22   : > { %v339_v52 = vadd.f32 %v307_v44, %v1681_v41  ;;  %v340_v53 = vadd.f32 %v307_v44, %v1683_v42  ;;  %v308_v54 = vperm.slane %v293_v46, 0  ;;  %v309_v55 = vperm.slane %v294_v47, 0  ;;  %s1759_s22 = scalar_lea.vmem [#allocation3], %s1084_s21  ;;  %s1439_s6 = sshra.s32 %s969_s30, 4  ;;  %s1440_s6 = int_to_ptr.hbm [resolvable:$true] %s1439_s6 }
  0x23   : > { %706 = vmatpush.bf16.msra.mxu0 %v1188_v22  ;;  %1355 = vmatpush.bf16.msra.mxu2 %v1188_v22  ;;  %v355_v56 = vadd.f32 %v315_v49, %v1681_v41  ;;  %v356_v57 = vadd.f32 %v315_v49, %v1683_v42  ;;  %v316_v58 = vperm.slane %v300_v50, 0  ;;  %v317_v59 = vperm.slane %v301_v51, 0  ;;  %s966_s18 = sshll.u32 %s1759_s22, 4  ;;  %s1441_s7 = scalar_lea.hbm %s1440_s6, 512  ;;  %s967_s18 = int_to_ptr.vmem [resolvable:$true] %s966_s18 }
  0x24   : > { %795 = vmatpush.bf16.msra.mxu1 %v1192_v26  ;;  %1363 = vmatpush.bf16.msra.mxu3 %v1192_v26  ;;  %v371_v60 = vmax.f32 %v339_v52, 0.0  ;;  %v372_v61 = vmax.f32 %v340_v53, 0.0  ;;  %v341_v62 = vadd.f32 %v308_v54, %v1681_v41  ;;  %v342_v63 = vadd.f32 %v308_v54, %v1683_v42  ;;  %p1442_p12 = scmp.ne.s32.totalorder %s1440_s6, %s1441_s7  ;;  %p1446_p1 = scmp.lt.s32.totalorder %s1440_s6, %s1930_s4 }
  0x25   : > { %v387_v0 = vmax.f32 %v355_v56, 0.0  ;;  %v388_v1 = vmax.f32 %v356_v57, 0.0  ;;  %v357_v2 = vadd.f32 %v316_v58, %v1681_v41  ;;  %v358_v3 = vadd.f32 %v316_v58, %v1683_v42  ;;  %p1447_p2 = scmp.lt.s32.totalorder %s1445_s10, %s1441_s7 }
  0x26   : > { %v1260_v4 = vpack.c.bf16 %v372_v61, %v371_v60  ;;  %v373_v5 = vmax.f32 %v341_v62, 0.0  ;;  %v374_v6 = vmax.f32 %v342_v63, 0.0  ;;  %v343_v7 = vadd.f32 %v309_v55, %v1681_v41  ;;  %p1443_p13 = pnand %p1442_p12, %p1572_p4 }
  0x27   : > { %707 = vmatpush.bf16.msra.mxu0 %v1180_v34  ;;  %1356 = vmatpush.bf16.msra.mxu2 %v1180_v34  ;;  %v1300_v10 = vpack.c.bf16 %v388_v1, %v387_v0  ;;  %v389_v11 = vmax.f32 %v357_v2, 0.0  ;;  %v390_v12 = vmax.f32 %v358_v3, 0.0  ;;  %v344_v13 = vadd.f32 %v309_v55, %v1683_v42  ;;  %p1448_p3 = por %p1447_p2, %p1446_p1 }
  0x28   : > { %796 = vmatpush.bf16.msra.mxu1 %v1184_v37  ;;  %1364 = vmatpush.bf16.msra.mxu3 %v1184_v37  ;;  %1261 = vst [vmem:[#allocation2 + $0x30] sm:$0xff] %v1260_v4   ;;  %v1265_v16 = vpack.c.bf16 %v374_v6, %v373_v5  ;;  %v375_v17 = vmax.f32 %v343_v7, 0.0  ;;  %v359_v18 = vadd.f32 %v317_v59, %v1681_v41  ;;  %v310_v32 = vperm.slane %v295_v30, 0  ;;  %p1444_p0 = pneg %p1443_p13 }
  0x29   : > { %v360_v19 = vadd.f32 %v317_v59, %v1683_v42  ;;  %1344 = vst [vmem:[#allocation2 + $0x40] sm:$0xff] %v1300_v10   ;;  %v1305_v20 = vpack.c.bf16 %v390_v12, %v389_v11  ;;  %v376_v21 = vmax.f32 %v344_v13, 0.0  ;;  %v1156_v22 = vor.u32 %v1225_v9, %v1155_v8 }
  0x2a   : > { %1337 = vst [vmem:[#allocation2] sm:$0xff] %v1265_v16   ;;  %v391_v23 = vmax.f32 %v359_v18, 0.0  ;;  %v1160_v25 = vor.u32 %v1224_v14, %v1157_v15  ;;  %v318_v33 = vperm.slane %v302_v31, 0  ;;  %v345_v34 = vadd.f32 %v310_v32, %v1681_v41  ;;  %p1449_p5 = pnand %p1448_p3, %p1444_p0 }
  0x2b   : > { %708 = vmatpush.bf16.msra.mxu0 %v1172_v38  ;;  %1357 = vmatpush.bf16.msra.mxu2 %v1172_v38  ;;  %v392_v24 = vmax.f32 %v360_v19, 0.0  ;;  %1345 = vst [vmem:[#allocation2 + $0x20] sm:$0xff] %v1305_v20   ;;  %v1270_v26 = vpack.c.bf16 %v376_v21, %v375_v17  ;;  %v346_v35 = vadd.f32 %v310_v32, %v1683_v42  ;;  %v296_v50 = vrot.slane %v1679_v40, 4 }
  0x2c   : > { %797 = vmatpush.bf16.msra.mxu1 %v1176_v39  ;;  %1365 = vmatpush.bf16.msra.mxu3 %v1176_v39  ;;  %v361_v36 = vadd.f32 %v318_v33, %v1681_v41  ;;  %v362_v37 = vadd.f32 %v318_v33, %v1683_v42  ;;  %v377_v38 = vmax.f32 %v345_v34, 0.0  ;;  %v303_v51 = vrot.slane %v1686_v45, 4 }
  0x2d   : > { %v1310_v27 = vpack.c.bf16 %v392_v24, %v391_v23  ;;  %1338 = vst [vmem:[#allocation2 + $0x58] sm:$0xff] %v1270_v26   ;;  %v378_v39 = vmax.f32 %v346_v35, 0.0  ;;  %v311_v52 = vperm.slane %v296_v50, 0  ;;  %v297_v2 = vrot.slane %v1679_v40, 5 }
  0x2e   : > { %v394_v44 = vmax.f32 %v362_v37, 0.0  ;;  %v319_v53 = vperm.slane %v303_v51, 0  ;;  %v304_v3 = vrot.slane %v1686_v45, 5  ;;  %v298_v18 = vrot.slane %v1679_v40, 6 }
  0x2f   : > { %709 = vmatpush.bf16.msra.mxu0 %v1164_v43  ;;  %1358 = vmatpush.bf16.msra.mxu2 %v1164_v43  ;;  %1346 = vst [vmem:[#allocation2 + $0x10] sm:$0xff] %v1310_v27   ;;  %v1240_v28 = vld [vmem:[#allocation2 + $0x30] sm:$0xff]  ;;  %v393_v43 = vmax.f32 %v361_v36, 0.0  ;;  %v1275_v46 = vpack.c.bf16 %v378_v39, %v377_v38  ;;  %v347_v54 = vadd.f32 %v311_v52, %v1681_v41  ;;  %v312_v4 = vperm.slane %v297_v2, 0 }
  0x30   : > { %798 = vmatpush.bf16.msra.mxu1 %v1168_v48  ;;  %1366 = vmatpush.bf16.msra.mxu3 %v1168_v48  ;;  %v1248_v29 = vld [vmem:[#allocation2 + $0x40] sm:$0xff]  ;;  %v348_v55 = vadd.f32 %v311_v52, %v1683_v42  ;;  %v363_v56 = vadd.f32 %v319_v53, %v1681_v41  ;;  %v364_v57 = vadd.f32 %v319_v53, %v1683_v42  ;;  %v320_v5 = vperm.slane %v304_v3, 0 }
  0x31   : > { %v1315_v47 = vpack.c.bf16 %v394_v44, %v393_v43  ;;  %1339 = vst [vmem:[#allocation2 + $0x18] sm:$0xff] %v1275_v46   ;;  %v1241_v48 = vld [vmem:[#allocation2] sm:$0xff]  ;;  %v379_v58 = vmax.f32 %v347_v54, 0.0  ;;  %v349_v6 = vadd.f32 %v312_v4, %v1681_v41  ;;  %v350_v7 = vadd.f32 %v312_v4, %v1683_v42 }
  0x32   : > { %v1249_v49 = vld [vmem:[#allocation2 + $0x20] sm:$0xff]  ;;  %v380_v59 = vmax.f32 %v348_v55, 0.0  ;;  %v395_v60 = vmax.f32 %v363_v56, 0.0  ;;  %v396_v61 = vmax.f32 %v364_v57, 0.0  ;;  %v365_v8 = vadd.f32 %v320_v5, %v1681_v41 }
  0x33   : > { %710 = vmatpush.bf16.msra.mxu0 %v1156_v22  ;;  %1359 = vmatpush.bf16.msra.mxu2 %v1156_v22  ;;  %1347 = vst [vmem:[#allocation2 + $0x38] sm:$0xff] %v1315_v47   ;;  %v366_v9 = vadd.f32 %v320_v5, %v1683_v42  ;;  %v381_v10 = vmax.f32 %v349_v6, 0.0  ;;  %v382_v11 = vmax.f32 %v350_v7, 0.0  ;;  %v305_v19 = vrot.slane %v1686_v45, 6  ;;  %v489_v54 = vld [vmem:[%s1929_s3] sm:$0x3] }
  0x34   : > { %799 = vmatpush.bf16.msra.mxu1 %v1160_v25  ;;  %1367 = vmatpush.bf16.msra.mxu3 %v1160_v25  ;;  %v1280_v62 = vpack.c.bf16 %v380_v59, %v379_v58  ;;  %v1320_v63 = vpack.c.bf16 %v396_v61, %v395_v60  ;;  %v1242_v0 = vld [vmem:[#allocation2 + $0x58] sm:$0xff]  ;;  %v397_v12 = vmax.f32 %v365_v8, 0.0  ;;  %v313_v20 = vperm.slane %v298_v18, 0 }
  0x35   : > { %v398_v13 = vmax.f32 %v366_v9, 0.0  ;;  %v1285_v14 = vpack.c.bf16 %v382_v11, %v381_v10  ;;  %v321_v21 = vperm.slane %v305_v19, 0  ;;  %v299_v34 = vrot.slane %v1679_v40, 7 }
  0x36   : > { %711 = vmatmul.bf16.vlgmr.msra.gmra.mxu0 %v1240_v28  ;;  %751 = vmatmul.bf16.vlgmr.msra.gmra.mxu2 %v1248_v29  ;;  %1340 = vst [vmem:[#allocation2 + $0x50] sm:$0xff] %v1280_v62   ;;  %v1250_v1 = vld [vmem:[#allocation2 + $0x10] sm:$0xff]  ;;  %v351_v22 = vadd.f32 %v313_v20, %v1681_v41  ;;  %v352_v23 = vadd.f32 %v313_v20, %v1683_v42  ;;  %v306_v35 = vrot.slane %v1686_v45, 7  ;;  %v1753_v55 = vperm.slane %v489_v54, 0 }
  0x37   : > { %800 = vmatmul.bf16.vlgmr.msra.gmra.mxu1 %v1240_v28  ;;  %840 = vmatmul.bf16.vlgmr.msra.gmra.mxu3 %v1248_v29  ;;  %1348 = vst [vmem:[#allocation2 + $0x60] sm:$0xff] %v1320_v63   ;;  %v1325_v15 = vpack.c.bf16 %v398_v13, %v397_v12  ;;  %v367_v24 = vadd.f32 %v321_v21, %v1681_v41  ;;  %v314_v36 = vperm.slane %v299_v34, 0  ;;  %v1755_v56 = vperm.slane %v489_v54, 1 }
  0x38   : > { %1341 = vst [vmem:[#allocation2 + $0x68] sm:$0xff] %v1285_v14   ;;  %v1243_v16 = vld [vmem:[#allocation2 + $0x18] sm:$0xff]  ;;  %v368_v25 = vadd.f32 %v321_v21, %v1683_v42  ;;  %v383_v26 = vmax.f32 %v351_v22, 0.0  ;;  %v384_v27 = vmax.f32 %v352_v23, 0.0  ;;  %v322_v37 = vperm.slane %v306_v35, 0 }
  0x39   : > { %1349 = vst [vmem:[#allocation2 + $0x70] sm:$0xff] %v1325_v15   ;;  %v399_v28 = vmax.f32 %v367_v24, 0.0  ;;  %v353_v38 = vadd.f32 %v314_v36, %v1681_v41  ;;  %v354_v39 = vadd.f32 %v314_v36, %v1683_v42 }
  0x3a   : > { %v1251_v17 = vld [vmem:[#allocation2 + $0x38] sm:$0xff]  ;;  %v400_v29 = vmax.f32 %v368_v25, 0.0  ;;  %v1290_v30 = vpack.c.bf16 %v384_v27, %v383_v26  ;;  %v369_v43 = vadd.f32 %v322_v37, %v1681_v41  ;;  %v370_v44 = vadd.f32 %v322_v37, %v1683_v42 }
  0x3b   : > { %v385_v46 = vmax.f32 %v353_v38, 0.0  ;;  %v386_v47 = vmax.f32 %v354_v39, 0.0 }
  0x3c   : > { %v1330_v31 = vpack.c.bf16 %v400_v29, %v399_v28  ;;  %1342 = vst [vmem:[#allocation2 + $0x8] sm:$0xff] %v1290_v30   ;;  %v402_v40 = vmax.f32 %v370_v44, 0.0 }
  0x3d   : > { %v1244_v32 = vld [vmem:[#allocation2 + $0x50] sm:$0xff] }
  0x3e   : > { %1350 = vst [vmem:[#allocation2 + $0x78] sm:$0xff] %v1330_v31   ;;  %v1252_v33 = vld [vmem:[#allocation2 + $0x60] sm:$0xff] }
  0x3f   : > { %v1245_v50 = vld [vmem:[#allocation2 + $0x68] sm:$0xff] }
  0x40   : > { %v1253_v51 = vld [vmem:[#allocation2 + $0x70] sm:$0xff] }
  0x43   : > { %v1246_v52 = vld [vmem:[#allocation2 + $0x8] sm:$0xff] }
  0x45   : > { %v1254_v41 = vld [vmem:[#allocation2 + $0x78] sm:$0xff] }
  0x46   : > { %716 = vmatmul.bf16.gmra.mxu0 %v1241_v48  ;;  %756 = vmatmul.bf16.gmra.mxu2 %v1249_v49 }
  0x47   : > { %805 = vmatmul.bf16.gmra.mxu1 %v1241_v48  ;;  %845 = vmatmul.bf16.gmra.mxu3 %v1249_v49  ;;  %v401_v48 = vmax.f32 %v369_v43, 0.0  ;;  %v1295_v49 = vpack.c.bf16 %v386_v47, %v385_v46 }
  0x49   : > { %v1335_v45 = vpack.c.bf16 %v402_v40, %v401_v48  ;;  %1343 = vst [vmem:[#allocation2 + $0x48] sm:$0xff] %v1295_v49  }
  0x4b   : > { %1351 = vst [vmem:[#allocation2 + $0x28] sm:$0xff] %v1335_v45  }
  0x50   : > { %v1247_v42 = vld [vmem:[#allocation2 + $0x48] sm:$0xff] }
  0x52   : > { %v1255_v53 = vld [vmem:[#allocation2 + $0x28] sm:$0xff] }
  0x56   : > { %721 = vmatmul.bf16.gmra.mxu0 %v1242_v0  ;;  %761 = vmatmul.bf16.gmra.mxu2 %v1250_v1 }
  0x57   : > { %810 = vmatmul.bf16.gmra.mxu1 %v1242_v0  ;;  %850 = vmatmul.bf16.gmra.mxu3 %v1250_v1 }
  0x66   : > { %726 = vmatmul.bf16.gmra.mxu0 %v1243_v16  ;;  %766 = vmatmul.bf16.gmra.mxu2 %v1251_v17 }
  0x67   : > { %815 = vmatmul.bf16.gmra.mxu1 %v1243_v16  ;;  %855 = vmatmul.bf16.gmra.mxu3 %v1251_v17 }
  0x76   : > { %731 = vmatmul.bf16.gmra.mxu0 %v1244_v32  ;;  %771 = vmatmul.bf16.gmra.mxu2 %v1252_v33 }
  0x77   : > { %820 = vmatmul.bf16.gmra.mxu1 %v1244_v32  ;;  %860 = vmatmul.bf16.gmra.mxu3 %v1252_v33 }
  0x86   : > { %736 = vmatmul.bf16.gmra.mxu0 %v1245_v50  ;;  %776 = vmatmul.bf16.gmra.mxu2 %v1253_v51 }
  0x87   : > { %825 = vmatmul.bf16.gmra.mxu1 %v1245_v50  ;;  %865 = vmatmul.bf16.gmra.mxu3 %v1253_v51 }
  0x96   : > { %741 = vmatmul.bf16.gmra.mxu0 %v1246_v52  ;;  %781 = vmatmul.bf16.gmra.mxu2 %v1254_v41 }
  0x97   : > { %830 = vmatmul.bf16.gmra.mxu1 %v1246_v52  ;;  %870 = vmatmul.bf16.gmra.mxu3 %v1254_v41 }
  0xa6   : > { %746 = vmatmul.bf16.gmra.mxu0 %v1247_v42  ;;  %786 = vmatmul.bf16.gmra.mxu2 %v1255_v53 }
  0xa7   : > { %835 = vmatmul.bf16.gmra.mxu1 %v1247_v42  ;;  %875 = vmatmul.bf16.gmra.mxu3 %v1255_v53 }
  0xb3   : > { %v712_v57 = vpop.f32.mrf.mxu0 }
  0xb4   : > { %v713_v58 = vadd.f32 %v712_v57, %v1753_v55  ;;  %v801_v59 = vpop.f32.mrf.mxu1 }
  0xb5   : > { %v802_v60 = vadd.f32 %v801_v59, %v1755_v56 }
  0xb6   : > { %881 = vst [vmem:[%s1759_s22] sm:$0xff] %v713_v58 }
  0xb7   : > { %882 = vst [vmem:[%s1759_s22 + $0x8] sm:$0xff] %v802_v60 }
  0xb9   : > { %v752_v61 = vpop.f32.mrf.mxu2 }
  0xba   : > { %v753_v62 = vadd.f32 %v752_v61, %v1753_v55  ;;  %v841_v63 = vpop.f32.mrf.mxu3 }
  0xbb   : > { %v714_v0 = vpop.f32.mrf.mxu0  ;;  %v842_v1 = vadd.f32 %v841_v63, %v1755_v56 }
  0xbc   : > { %v715_v2 = vadd.f32 %v714_v0, %v1753_v55  ;;  %v803_v3 = vpop.f32.mrf.mxu1  ;;  %913 = vst [vmem:[%s1759_s22 + $0x100] sm:$0xff] %v753_v62 }
  0xbd   : > { %v804_v4 = vadd.f32 %v803_v3, %v1755_v56  ;;  %914 = vst [vmem:[%s1759_s22 + $0x108] sm:$0xff] %v842_v1 }
  0xbe   : > { %883 = vst [vmem:[%s1759_s22 + $0x10] sm:$0xff] %v715_v2 }
  0xbf   : > { %884 = vst [vmem:[%s1759_s22 + $0x18] sm:$0xff] %v804_v4 }
  0xc1   : > { %v754_v5 = vpop.f32.mrf.mxu2 }
  0xc2   : > { %v755_v6 = vadd.f32 %v754_v5, %v1753_v55  ;;  %v843_v7 = vpop.f32.mrf.mxu3 }
  0xc3   : > { %v717_v8 = vpop.f32.mrf.mxu0  ;;  %v844_v9 = vadd.f32 %v843_v7, %v1755_v56 }
  0xc4   : > { %v718_v10 = vadd.f32 %v717_v8, %v1753_v55  ;;  %v806_v11 = vpop.f32.mrf.mxu1  ;;  %915 = vst [vmem:[%s1759_s22 + $0x110] sm:$0xff] %v755_v6 }
  0xc5   : > { %v807_v12 = vadd.f32 %v806_v11, %v1755_v56  ;;  %916 = vst [vmem:[%s1759_s22 + $0x118] sm:$0xff] %v844_v9 }
  0xc6   : > { %885 = vst [vmem:[%s1759_s22 + $0x20] sm:$0xff] %v718_v10 }
  0xc7   : > { %886 = vst [vmem:[%s1759_s22 + $0x28] sm:$0xff] %v807_v12 }
  0xc9   : > { %v757_v13 = vpop.f32.mrf.mxu2 }
  0xca   : > { %v758_v14 = vadd.f32 %v757_v13, %v1753_v55  ;;  %v846_v15 = vpop.f32.mrf.mxu3 }
  0xcb   : > { %v719_v16 = vpop.f32.mrf.mxu0  ;;  %v847_v17 = vadd.f32 %v846_v15, %v1755_v56 }
  0xcc   : > { %v720_v18 = vadd.f32 %v719_v16, %v1753_v55  ;;  %v808_v19 = vpop.f32.mrf.mxu1  ;;  %917 = vst [vmem:[%s1759_s22 + $0x120] sm:$0xff] %v758_v14 }
  0xcd   : > { %v809_v20 = vadd.f32 %v808_v19, %v1755_v56  ;;  %918 = vst [vmem:[%s1759_s22 + $0x128] sm:$0xff] %v847_v17 }
  0xce   : > { %887 = vst [vmem:[%s1759_s22 + $0x30] sm:$0xff] %v720_v18 }
  0xcf   : > { %888 = vst [vmem:[%s1759_s22 + $0x38] sm:$0xff] %v809_v20 }
  0xd1   : > { %v759_v21 = vpop.f32.mrf.mxu2 }
  0xd2   : > { %v760_v22 = vadd.f32 %v759_v21, %v1753_v55  ;;  %v848_v23 = vpop.f32.mrf.mxu3 }
  0xd3   : > { %v722_v24 = vpop.f32.mrf.mxu0  ;;  %v849_v25 = vadd.f32 %v848_v23, %v1755_v56 }
  0xd4   : > { %v723_v26 = vadd.f32 %v722_v24, %v1753_v55  ;;  %v811_v27 = vpop.f32.mrf.mxu1  ;;  %919 = vst [vmem:[%s1759_s22 + $0x130] sm:$0xff] %v760_v22 }
  0xd5   : > { %v812_v28 = vadd.f32 %v811_v27, %v1755_v56  ;;  %920 = vst [vmem:[%s1759_s22 + $0x138] sm:$0xff] %v849_v25 }
  0xd6   : > { %889 = vst [vmem:[%s1759_s22 + $0x40] sm:$0xff] %v723_v26 }
  0xd7   : > { %890 = vst [vmem:[%s1759_s22 + $0x48] sm:$0xff] %v812_v28 }
  0xd9   : > { %v762_v29 = vpop.f32.mrf.mxu2 }
  0xda   : > { %v763_v30 = vadd.f32 %v762_v29, %v1753_v55  ;;  %v851_v31 = vpop.f32.mrf.mxu3 }
  0xdb   : > { %v724_v32 = vpop.f32.mrf.mxu0  ;;  %v852_v33 = vadd.f32 %v851_v31, %v1755_v56 }
  0xdc   : > { %v725_v34 = vadd.f32 %v724_v32, %v1753_v55  ;;  %v813_v35 = vpop.f32.mrf.mxu1  ;;  %921 = vst [vmem:[%s1759_s22 + $0x140] sm:$0xff] %v763_v30 }
  0xdd   : > { %v814_v36 = vadd.f32 %v813_v35, %v1755_v56  ;;  %922 = vst [vmem:[%s1759_s22 + $0x148] sm:$0xff] %v852_v33 }
  0xde   : > { %891 = vst [vmem:[%s1759_s22 + $0x50] sm:$0xff] %v725_v34 }
  0xdf   : > { %892 = vst [vmem:[%s1759_s22 + $0x58] sm:$0xff] %v814_v36 }
  0xe1   : > { %v764_v37 = vpop.f32.mrf.mxu2 }
  0xe2   : > { %v765_v38 = vadd.f32 %v764_v37, %v1753_v55  ;;  %v853_v39 = vpop.f32.mrf.mxu3 }
  0xe3   : > { %v727_v43 = vpop.f32.mrf.mxu0  ;;  %v854_v44 = vadd.f32 %v853_v39, %v1755_v56 }
  0xe4   : > { %v728_v46 = vadd.f32 %v727_v43, %v1753_v55  ;;  %v816_v47 = vpop.f32.mrf.mxu1  ;;  %923 = vst [vmem:[%s1759_s22 + $0x150] sm:$0xff] %v765_v38 }
  0xe5   : > { %v817_v48 = vadd.f32 %v816_v47, %v1755_v56  ;;  %924 = vst [vmem:[%s1759_s22 + $0x158] sm:$0xff] %v854_v44 }
  0xe6   : > { %893 = vst [vmem:[%s1759_s22 + $0x60] sm:$0xff] %v728_v46 }
  0xe7   : > { %894 = vst [vmem:[%s1759_s22 + $0x68] sm:$0xff] %v817_v48 }
  0xe9   : > { %v767_v40 = vpop.f32.mrf.mxu2 }
  0xea   : > { %v768_v49 = vadd.f32 %v767_v40, %v1753_v55  ;;  %v856_v45 = vpop.f32.mrf.mxu3 }
  0xeb   : > { %v729_v50 = vpop.f32.mrf.mxu0  ;;  %v857_v51 = vadd.f32 %v856_v45, %v1755_v56 }
  0xec   : > { %v730_v52 = vadd.f32 %v729_v50, %v1753_v55  ;;  %v818_v41 = vpop.f32.mrf.mxu1  ;;  %925 = vst [vmem:[%s1759_s22 + $0x160] sm:$0xff] %v768_v49 }
  0xed   : > { %v819_v42 = vadd.f32 %v818_v41, %v1755_v56  ;;  %926 = vst [vmem:[%s1759_s22 + $0x168] sm:$0xff] %v857_v51 }
  0xee   : > { %895 = vst [vmem:[%s1759_s22 + $0x70] sm:$0xff] %v730_v52 }
  0xef   : > { %896 = vst [vmem:[%s1759_s22 + $0x78] sm:$0xff] %v819_v42 }
  0xf1   : > { %v769_v53 = vpop.f32.mrf.mxu2 }
  0xf2   : > { %v770_v54 = vadd.f32 %v769_v53, %v1753_v55  ;;  %v858_v57 = vpop.f32.mrf.mxu3 }
  0xf3   : > { %v732_v58 = vpop.f32.mrf.mxu0  ;;  %v859_v59 = vadd.f32 %v858_v57, %v1755_v56 }
  0xf4   : > { %v733_v60 = vadd.f32 %v732_v58, %v1753_v55  ;;  %v821_v61 = vpop.f32.mrf.mxu1  ;;  %927 = vst [vmem:[%s1759_s22 + $0x170] sm:$0xff] %v770_v54 }
  0xf5   : > { %v822_v62 = vadd.f32 %v821_v61, %v1755_v56  ;;  %928 = vst [vmem:[%s1759_s22 + $0x178] sm:$0xff] %v859_v59 }
  0xf6   : > { %897 = vst [vmem:[%s1759_s22 + $0x80] sm:$0xff] %v733_v60 }
  0xf7   : > { %898 = vst [vmem:[%s1759_s22 + $0x88] sm:$0xff] %v822_v62 }
  0xf9   : > { %v772_v63 = vpop.f32.mrf.mxu2 }
  0xfa   : > { %v773_v0 = vadd.f32 %v772_v63, %v1753_v55  ;;  %v861_v1 = vpop.f32.mrf.mxu3 }
  0xfb   : > { %v734_v2 = vpop.f32.mrf.mxu0  ;;  %v862_v3 = vadd.f32 %v861_v1, %v1755_v56 }
  0xfc   : > { %v735_v4 = vadd.f32 %v734_v2, %v1753_v55  ;;  %v823_v5 = vpop.f32.mrf.mxu1  ;;  %929 = vst [vmem:[%s1759_s22 + $0x180] sm:$0xff] %v773_v0 }
  0xfd   : > { %v824_v6 = vadd.f32 %v823_v5, %v1755_v56  ;;  %930 = vst [vmem:[%s1759_s22 + $0x188] sm:$0xff] %v862_v3 }
  0xfe   : > { %899 = vst [vmem:[%s1759_s22 + $0x90] sm:$0xff] %v735_v4 }
  0xff   : > { %900 = vst [vmem:[%s1759_s22 + $0x98] sm:$0xff] %v824_v6 }
 0x101   : > { %v774_v7 = vpop.f32.mrf.mxu2 }
 0x102   : > { %v775_v8 = vadd.f32 %v774_v7, %v1753_v55  ;;  %v863_v9 = vpop.f32.mrf.mxu3 }
 0x103   : > { %v737_v10 = vpop.f32.mrf.mxu0  ;;  %v864_v11 = vadd.f32 %v863_v9, %v1755_v56 }
 0x104   : > { %v738_v12 = vadd.f32 %v737_v10, %v1753_v55  ;;  %v826_v13 = vpop.f32.mrf.mxu1  ;;  %931 = vst [vmem:[%s1759_s22 + $0x190] sm:$0xff] %v775_v8 }
 0x105   : > { %v827_v14 = vadd.f32 %v826_v13, %v1755_v56  ;;  %932 = vst [vmem:[%s1759_s22 + $0x198] sm:$0xff] %v864_v11 }
 0x106   : > { %901 = vst [vmem:[%s1759_s22 + $0xa0] sm:$0xff] %v738_v12 }
 0x107   : > { %902 = vst [vmem:[%s1759_s22 + $0xa8] sm:$0xff] %v827_v14 }
 0x109   : > { %v777_v15 = vpop.f32.mrf.mxu2 }
 0x10a   : > { %v778_v16 = vadd.f32 %v777_v15, %v1753_v55  ;;  %v866_v17 = vpop.f32.mrf.mxu3 }
 0x10b   : > { %v739_v18 = vpop.f32.mrf.mxu0  ;;  %v867_v19 = vadd.f32 %v866_v17, %v1755_v56 }
 0x10c   : > { %v740_v20 = vadd.f32 %v739_v18, %v1753_v55  ;;  %v828_v21 = vpop.f32.mrf.mxu1  ;;  %933 = vst [vmem:[%s1759_s22 + $0x1a0] sm:$0xff] %v778_v16 }
 0x10d   : > { %v829_v22 = vadd.f32 %v828_v21, %v1755_v56  ;;  %934 = vst [vmem:[%s1759_s22 + $0x1a8] sm:$0xff] %v867_v19 }
 0x10e   : > { %903 = vst [vmem:[%s1759_s22 + $0xb0] sm:$0xff] %v740_v20 }
 0x10f   : > { %904 = vst [vmem:[%s1759_s22 + $0xb8] sm:$0xff] %v829_v22 }
 0x111   : > { %v779_v23 = vpop.f32.mrf.mxu2 }
 0x112   : > { %v780_v24 = vadd.f32 %v779_v23, %v1753_v55  ;;  %v868_v25 = vpop.f32.mrf.mxu3 }
 0x113   : > { %v742_v26 = vpop.f32.mrf.mxu0  ;;  %v869_v27 = vadd.f32 %v868_v25, %v1755_v56 }
 0x114   : > { %v743_v28 = vadd.f32 %v742_v26, %v1753_v55  ;;  %v831_v29 = vpop.f32.mrf.mxu1  ;;  %935 = vst [vmem:[%s1759_s22 + $0x1b0] sm:$0xff] %v780_v24 }
 0x115   : > { %v832_v30 = vadd.f32 %v831_v29, %v1755_v56  ;;  %936 = vst [vmem:[%s1759_s22 + $0x1b8] sm:$0xff] %v869_v27 }
 0x116   : > { %905 = vst [vmem:[%s1759_s22 + $0xc0] sm:$0xff] %v743_v28 }
 0x117   : > { %906 = vst [vmem:[%s1759_s22 + $0xc8] sm:$0xff] %v832_v30 }
 0x119   : > { %v782_v31 = vpop.f32.mrf.mxu2 }
 0x11a   : > { %v783_v32 = vadd.f32 %v782_v31, %v1753_v55  ;;  %v871_v33 = vpop.f32.mrf.mxu3 }
 0x11b   : > { %v744_v34 = vpop.f32.mrf.mxu0  ;;  %v872_v35 = vadd.f32 %v871_v33, %v1755_v56 }
 0x11c   : > { %v745_v36 = vadd.f32 %v744_v34, %v1753_v55  ;;  %v833_v37 = vpop.f32.mrf.mxu1  ;;  %937 = vst [vmem:[%s1759_s22 + $0x1c0] sm:$0xff] %v783_v32 }
 0x11d   : > { %v834_v38 = vadd.f32 %v833_v37, %v1755_v56  ;;  %938 = vst [vmem:[%s1759_s22 + $0x1c8] sm:$0xff] %v872_v35 }
 0x11e   : > { %907 = vst [vmem:[%s1759_s22 + $0xd0] sm:$0xff] %v745_v36 }
 0x11f   : > { %908 = vst [vmem:[%s1759_s22 + $0xd8] sm:$0xff] %v834_v38 }
 0x121   : > { %v784_v39 = vpop.f32.mrf.mxu2 }
 0x122   : > { %v785_v43 = vadd.f32 %v784_v39, %v1753_v55  ;;  %v873_v44 = vpop.f32.mrf.mxu3 }
 0x123   : > { %v747_v46 = vpop.f32.mrf.mxu0  ;;  %v874_v47 = vadd.f32 %v873_v44, %v1755_v56 }
 0x124   : > { %v748_v48 = vadd.f32 %v747_v46, %v1753_v55  ;;  %v836_v40 = vpop.f32.mrf.mxu1  ;;  %939 = vst [vmem:[%s1759_s22 + $0x1d0] sm:$0xff] %v785_v43 }
 0x125   : > { %v837_v49 = vadd.f32 %v836_v40, %v1755_v56  ;;  %940 = vst [vmem:[%s1759_s22 + $0x1d8] sm:$0xff] %v874_v47 }
 0x126   : > { %909 = vst [vmem:[%s1759_s22 + $0xe0] sm:$0xff] %v748_v48 }
 0x127   : > { %910 = vst [vmem:[%s1759_s22 + $0xe8] sm:$0xff] %v837_v49 }
 0x129   : > { %v787_v45 = vpop.f32.mrf.mxu2 }
 0x12a   : > { %v788_v50 = vadd.f32 %v787_v45, %v1753_v55  ;;  %v876_v51 = vpop.f32.mrf.mxu3 }
 0x12b   : > { %v749_v52 = vpop.f32.mrf.mxu0  ;;  %v877_v41 = vadd.f32 %v876_v51, %v1755_v56 }
 0x12c   : > { %v750_v42 = vadd.f32 %v749_v52, %v1753_v55  ;;  %v838_v53 = vpop.f32.mrf.mxu1  ;;  %941 = vst [vmem:[%s1759_s22 + $0x1e0] sm:$0xff] %v788_v50 }
 0x12d   : > { %v839_v54 = vadd.f32 %v838_v53, %v1755_v56  ;;  %942 = vst [vmem:[%s1759_s22 + $0x1e8] sm:$0xff] %v877_v41 }
 0x12e   : > { %911 = vst [vmem:[%s1759_s22 + $0xf0] sm:$0xff] %v750_v42 }
 0x12f   : > { %912 = vst [vmem:[%s1759_s22 + $0xf8] sm:$0xff] %v839_v54 }
 0x131   : > { %v789_v57 = vpop.f32.mrf.mxu2 }
 0x132   : > { %v790_v58 = vadd.f32 %v789_v57, %v1753_v55  ;;  %v878_v59 = vpop.f32.mrf.mxu3 }
 0x133   : > { %v879_v60 = vadd.f32 %v878_v59, %v1755_v56 }
 0x134   : > { %943 = vst [vmem:[%s1759_s22 + $0x1f0] sm:$0xff] %v790_v58 }
 0x135   : > { %944 = vst [vmem:[%s1759_s22 + $0x1f8] sm:$0xff] %v879_v60 }
 0x136   : > { %1452 = shalt.err (!%p1449_p5)
}
 0x137   : > { %s1505_s11 = smov 256   ;;  %s1506_s21 = smov 16  }
 0x138   : > { %1368 = dma.vmem_to_hbm [thread:$0]  (%p1572_p4), %s967_s18, 8192, %s969_s30, %s946_s5, %s1505_s11, %s1505_s11, %s1506_s21  }
 0x139 PF: > { %p1374_p6 = scmp.ge.s32.totalorder %s1503_s20, 2  ;;  %s983_s22 = sand.u32 1, %s1483_s15  }
 0x13a   : > { %s984_s24 = scalar_lea.sflag [#allocation4], %s983_s22 }
 0x13b   : > { %p1371_p7 = pnand %p1374_p6, %p1579_p8 }
 0x13d   : > { %p1372_p9 = pneg %p1371_p7 }
 0x13f   : > { %1478 = dma.done.wait (%p1372_p9), %s984_s24, 8192  }
 0x140   : > { %1480 = vsyncadd (%p1372_p9), %s984_s24, 4294959104  ;;  %s17_s20 = sadd.s32 1, %s1503_s20   ;;  %s1933_s15 = smov %s1487_s16 }
 0x141   : > { %p14_p10 = scmp.ge.s32.totalorder %s17_s20, 4   ;;  %s1934_s16 = smov %s1491_s17 }
 0x142   : > { %s1935_s17 = smov %s1585_s28  ;;  %s1936_s18 = smov %s1499_s19 }
 0x143   : > { %s1937_s19 = smov %s1939_s23  ;;  %16 = sbr.rel (!%p14_p10) target bundleno = 4 (0x4), region = 80 }
 0x148   :  { %990 = vsyncpa [#allocation4], 1 }
 0x149   :  { %992 = vsyncpa [#allocation4 + $0x1], 1 }

</bundles_post_ra>
